<compile_context>
chip_gen: v7x
topology: tpu7x:2x2x1
jax: 0.10.0
libtpu: 0.0.40
codegen_flags: <defaults>
</compile_context>

<pallas_src>
import math

import jax
import jax.numpy as jnp
from jax import lax
from jax.experimental import pallas as pl
from jax.experimental.pallas import tpu as pltpu


# ----------------------------- small shared math -----------------------------

def _l2norm(v, axis=1, eps=1e-12):
    # matches torch.nn.functional.normalize(p=2, dim=1): x / max(||x||, eps)
    return v / jnp.maximum(jnp.sqrt(jnp.sum(v * v, axis=axis, keepdims=True)), eps)


def _sinkhorn(out, epsilon):
    q = jnp.exp(out / epsilon)
    return q / jnp.sum(q, axis=1, keepdims=True)


def _concrete_bern(prob, noise_u, temp=0.07):
    noise = jnp.log(noise_u) - jnp.log(1.0 - noise_u)
    logit = jnp.log(prob + 1e-10) - jnp.log(1.0 - prob + 1e-10)
    return jax.nn.sigmoid((logit + noise) / temp)


# -------- kernel 1: batch-tiled embedding + cluster similarity (+ batch sum) --

def _embed_prob_kernel(x_ref, wt_ref, b_ref, cn_ref, xemb_ref, probsum_ref):
    """x_ref:       (Bt, n_vars, seq_len)    pre-transposed input tile
       wt_ref:      (seq_len, d_model)       Linear weight (W.T), grid-constant
       b_ref:       (1, d_model)             Linear bias, grid-constant
       cn_ref:      (n_cluster, d_model)     l2-normalized cluster emb, grid-constant
       xemb_ref:    (Bt, n_vars, d_model)    per-variable embeddings (streamed out)
       probsum_ref: (1, n_vars, n_cluster)   batch-sum of cosine logits (resident acc)"""
    @pl.when(pl.program_id(1) == 0)
    def _():
        probsum_ref[...] = jnp.zeros_like(probsum_ref)

    xb = x_ref[...].astype(jnp.float32)                      # (Bt, n_vars, seq_len)
    bt, nv, sl = xb.shape

    # x.permute(0,2,1) @ W.T + b : the permute was folded once in the wrapper,
    # so this is a clean last-dim MXU contraction on a (Bt*n_vars, seq_len) slab.
    emb = jnp.dot(xb.reshape(bt * nv, sl),
                  wt_ref[...].astype(jnp.float32),
                  preferred_element_type=jnp.float32) + b_ref[...]   # (Bt*nv, d_model)
    xemb_ref[...] = emb.reshape(bt, nv, -1).astype(xemb_ref.dtype)

    # l2-normalize rows over d_model (== F.normalize(dim=1) on the flat view).
    norm = jnp.maximum(jnp.sqrt(jnp.sum(emb * emb, axis=-1, keepdims=True)), 1e-12)
    xn = emb / norm

    # prob[(b,v), c] = <xn[(b,v)], cn[c]>   (rhs-contracted MXU matmul)
    prob = lax.dot_general(xn, cn_ref[...].astype(jnp.float32),
                           (((1,), (1,)), ((), ())),
                           preferred_element_type=jnp.float32)       # (Bt*nv, n_cluster)

    # Accumulate the batch sum in VMEM; mean + sinkhorn happen on the tiny
    # (n_vars, n_cluster) result in XLA.  No (bs, n_vars, n_cluster) HBM traffic.
    probsum_ref[...] += jnp.sum(prob.reshape(bt, nv, -1), axis=0)[None]


# -------- kernel 2: batch-tiled masked cross attention (+ batch sum) ----------

def _cluster_attn_kernel(qs_ref, xemb_ref, maskT_ref, outsum_ref):
    """qs_ref:     (n_cluster, d_model)      queries pre-scaled by 1/sqrt(d_model)
       xemb_ref:   (Bt, n_vars, d_model)     keys == values for this batch tile
       maskT_ref:  (n_cluster, n_vars)       soft cluster->variable mask, grid-constant
       outsum_ref: (1, n_cluster, d_model)   batch-sum of attention output (resident acc)"""
    @pl.when(pl.program_id(1) == 0)
    def _():
        outsum_ref[...] = jnp.zeros_like(outsum_ref)

    q = qs_ref[...].astype(jnp.float32)                      # (n_cluster, d_model)
    kv = xemb_ref[...].astype(jnp.float32)                   # (Bt, n_vars, d_model)
    bt = kv.shape[0]

    qb = jnp.broadcast_to(q, (bt,) + q.shape)                # (Bt, n_cluster, d_model)
    # scores[b, l, s] = <q[l], kv[b, s]>   ('bld,bsd->bls' batched MXU matmul)
    scores = lax.dot_general(qb, kv, (((2,), (2,)), ((0,), (0,))),
                             preferred_element_type=jnp.float32)     # (Bt, L, S)

    # numerically stable softmax over the n_vars axis; denominator on the EUP
    # slot (approx reciprocal), fused with the mask multiply.
    m = jnp.max(scores, axis=-1, keepdims=True)
    p = jnp.exp(scores - m)
    inv = pl.reciprocal(jnp.sum(p, axis=-1, keepdims=True), approx=True)
    # TODO(synk): MaskAttention's source is not in the spec; we assume the soft
    # Bernoulli mask gates the softmaxed attention weights multiplicatively.
    attn = p * maskT_ref[...].astype(jnp.float32)[None] * inv
    # attention dropout (p=0.1) omitted: eval-mode forward.

    out = lax.dot_general(attn, kv, (((2,), (1,)), ((0,), (0,))),
                          preferred_element_type=jnp.float32)        # (Bt, L, d_model)
    outsum_ref[...] += jnp.sum(out, axis=0)[None]


# ------------------------------- tiling helper --------------------------------

def _pick_tiling(bs, seq_len, n_vars, d_model, n_cluster,
                 max_block_b=16, vmem_budget_bytes=24 * 2**20):
    """Pick (n_splits, block_b, n_bt, vmem_limit_bytes).

    * n_splits=2 keeps a leading "parallel" grid axis so v7x megacore still gets
      2x sharding even though the batch axis itself is an "arbitrary" reduction.
    * block_b is the largest divisor of bs/n_splits (<= max_block_b) whose
      double-buffered tile footprint stays under the budget (sized against
      v7x's 64 MiB VMEM; v5e/v6e have more headroom).
    """
    n_splits = 2 if (bs >= 2 and bs % 2 == 0) else 1
    per_split = bs // n_splits

    def footprint(bb):
        per_step = bb * n_vars * (seq_len + d_model)                 # x tile + x_emb tile
        const = (seq_len * d_model + d_model + 2 * n_cluster * d_model
                 + n_cluster * n_vars + n_vars * n_cluster)
        return 4 * 2 * (per_step + const)                            # f32, double-buffered

    block_b = 1
    for cand in range(1, min(per_split, max_block_b) + 1):
        if per_split % cand == 0 and footprint(cand) <= vmem_budget_bytes:
            block_b = cand
    n_bt = per_split // block_b
    vmem_limit = int(min(48 * 2**20, max(32 * 2**20, 2 * footprint(block_b))))
    return n_splits, block_b, n_bt, vmem_limit


# --------------------------------- wrapper ------------------------------------

def cluster_assigner_forward(x, cluster_emb, wt, bias, noise_u, epsilon=0.05,
                             max_block_b=16, emb_dtype=jnp.float32):
    """Pallas implementation of Cluster_assigner.forward.

    x:           (bs, seq_len, n_vars)
    cluster_emb: (n_cluster, d_model)
    wt:          (seq_len, d_model)   == nn.Linear(seq_len, d_model).weight.T
    bias:        (d_model,)
    noise_u:     (n_vars, n_cluster)  uniform(1e-10, 1-1e-10) noise for concrete_bern
    Returns (prob_avg, cluster_emb_avg).

    emb_dtype: dtype of the x_emb HBM intermediate (set jnp.bfloat16 to halve
    that DMA path if strict f32 parity is not required).
    """
    bs, seq_len, n_vars = x.shape
    n_cluster, d_model = cluster_emb.shape

    n_splits, block_b, n_bt, vmem_limit = _pick_tiling(
        bs, seq_len, n_vars, d_model, n_cluster, max_block_b)

    # Fold x.permute(0, 2, 1) once in XLA (one HBM-rate transpose) so both the
    # DMA and the MXU contraction see seq_len on the lane axis, not n_vars.
    xt = jnp.transpose(x, (0, 2, 1))                                 # (bs, n_vars, seq_len)
    bias2d = bias.reshape(1, d_model).astype(jnp.float32)

    # Hoist grid-constant math out of the kernels.
    ce_norm = _l2norm(cluster_emb.astype(jnp.float32))               # kernel 1
    q_scaled = cluster_emb.astype(jnp.float32) / math.sqrt(d_model)  # kernel 2 (scale folded)

    cp = pltpu.CompilerParams(
        dimension_semantics=("parallel", "arbitrary"),  # split axis shards on v7x megacore
        vmem_limit_bytes=vmem_limit)

    batch_idx = lambda s, t: (s * n_bt + t, 0, 0)
    const2d = lambda s, t: (0, 0)
    split_idx = lambda s, t: (s, 0, 0)

    # NOTE: wt / bias / cluster_emb / mask specs are grid-constant; adding
    # pipeline_mode=pl.Buffered(1) there frees one VMEM buffer each once
    # block_b grows (most valuable on v7x / v5e).
    x_emb, prob_sum = pl.pallas_call(
        _embed_prob_kernel,
        out_shape=(
            jax.ShapeDtypeStruct((bs, n_vars, d_model), emb_dtype),
            jax.ShapeDtypeStruct((n_splits, n_vars, n_cluster), jnp.float32),
        ),
        grid=(n_splits, n_bt),
        in_specs=[
            pl.BlockSpec((block_b, n_vars, seq_len), batch_idx),
            pl.BlockSpec((seq_len, d_model), const2d),
            pl.BlockSpec((1, d_model), const2d),
            pl.BlockSpec((n_cluster, d_model), const2d),
        ],
        out_specs=(
            pl.BlockSpec((block_b, n_vars, d_model), batch_idx),
            pl.BlockSpec((1, n_vars, n_cluster), split_idx),
        ),
        compiler_params=cp,
    )(xt, wt, bias2d, ce_norm)

    # Tiny (n_vars, n_cluster) cross-batch glue kept in XLA.
    # (The PyTorch forward also computes sinkhorn(prob.reshape(-1, n_cluster))
    #  into prob_temp but never uses it -> dead code, omitted.)
    prob_avg = _sinkhorn(jnp.sum(prob_sum, axis=0) / bs, epsilon)    # (n_vars, n_cluster)
    mask_t = _concrete_bern(prob_avg, noise_u).T                     # (n_cluster, n_vars)

    cluster_sum = pl.pallas_call(
        _cluster_attn_kernel,
        out_shape=jax.ShapeDtypeStruct((n_splits, n_cluster, d_model), jnp.float32),
        grid=(n_splits, n_bt),
        in_specs=[
            pl.BlockSpec((n_cluster, d_model), const2d),
            pl.BlockSpec((block_b, n_vars, d_model), batch_idx),
            pl.BlockSpec((n_cluster, n_vars), const2d),
        ],
        out_specs=pl.BlockSpec((1, n_cluster, d_model), split_idx),
        compiler_params=cp,
    )(q_scaled, x_emb, mask_t)

    cluster_emb_avg = jnp.sum(cluster_sum, axis=0) / bs              # (n_cluster, d_model)
    return prob_avg, cluster_emb_avg


# --------------------------- pure-JAX reference --------------------------------

def _reference(x, cluster_emb, wt, bias, noise_u, epsilon=0.05):
    bs, seq_len, n_vars = x.shape
    n_cluster, d_model = cluster_emb.shape
    xp = jnp.transpose(x, (0, 2, 1))                                 # (bs, n_vars, seq_len)
    x_emb = xp @ wt + bias                                           # (bs, n_vars, d_model)
    x_flat = x_emb.reshape(-1, d_model)
    prob = (_l2norm(x_flat) @ _l2norm(cluster_emb).T).reshape(bs, n_vars, n_cluster)
    prob_avg = _sinkhorn(jnp.mean(prob, axis=0), epsilon)
    mask = _concrete_bern(prob_avg, noise_u)
    scale = 1.0 / math.sqrt(d_model)
    q = jnp.broadcast_to(cluster_emb, (bs, n_cluster, d_model))
    scores = jnp.einsum("bld,bsd->bls", q, x_emb) * scale
    attn = jax.nn.softmax(scores, axis=-1) * mask.T[None]
    out = jnp.einsum("bls,bsd->bld", attn, x_emb)
    return prob_avg, jnp.mean(out, axis=0)


if __name__ == "__main__":
    key = jax.random.PRNGKey(0)
    k1, k2, k3, k4, k5 = jax.random.split(key, 5)

    bs, seq_len, n_vars = 2, 16, 8
    n_cluster, d_model = 4, 32
    epsilon = 0.05

    x = jax.random.normal(k1, (bs, seq_len, n_vars), jnp.float32)
    cluster_emb = jax.random.normal(k2, (n_cluster, d_model), jnp.float32) * 0.1
    wt = jax.random.normal(k3, (seq_len, d_model), jnp.float32) / math.sqrt(seq_len)
    bias = jax.random.normal(k4, (d_model,), jnp.float32) * 0.01
    noise_u = jax.random.uniform(
        k5, (n_vars, n_cluster), jnp.float32, minval=1e-10, maxval=1.0 - 1e-10
    )

    prob_avg, cluster_avg = cluster_assigner_forward(
        x, cluster_emb, wt, bias, noise_u, epsilon
    )
    jax.block_until_ready((prob_avg, cluster_avg))

    prob_ref, cluster_ref = _reference(x, cluster_emb, wt, bias, noise_u, epsilon)
    assert prob_avg.shape == (n_vars, n_cluster)
    assert cluster_avg.shape == (n_cluster, d_model)
    # prob path is exact-precision; attention path uses approx EUP reciprocal.
    assert jnp.allclose(prob_avg, prob_ref, atol=1e-4, rtol=1e-4)
    assert jnp.allclose(cluster_avg, cluster_ref, atol=3e-3, rtol=3e-3)

    print("KERNEL_OK")
</pallas_src>

<mosaic_0001>
module attributes {stable_mosaic.version = 11 : i64} {
  func.func @_embed_prob_kernel(%arg0: i32, %arg1: i32, %arg2: memref<1x8x16xf32, #tpu.memory_space<vmem>>, %arg3: memref<16x32xf32, #tpu.memory_space<vmem>>, %arg4: memref<1x32xf32, #tpu.memory_space<vmem>>, %arg5: memref<4x32xf32, #tpu.memory_space<vmem>>, %arg6: memref<1x8x32xf32, #tpu.memory_space<vmem>>, %arg7: memref<1x8x4xf32, #tpu.memory_space<vmem>>) attributes {dimension_semantics = [#tpu.dimension_semantics<parallel>, #tpu.dimension_semantics<arbitrary>], iteration_bounds = array<i64: 2, 1>, scalar_prefetch = 0 : i64, scratch_operands = 0 : i64, tpu.core_type = #tpu.core_type<tc>, window_params = [{transform_indices = @transform_0, window_bounds = array<i64: 1, 8, 16>}, {pipeline_mode = #tpu.pipeline_mode<synchronous>, transform_indices = @transform_1, window_bounds = array<i64: 16, 32>}, {pipeline_mode = #tpu.pipeline_mode<synchronous>, transform_indices = @transform_2, window_bounds = array<i64: 1, 32>}, {pipeline_mode = #tpu.pipeline_mode<synchronous>, transform_indices = @transform_3, window_bounds = array<i64: 4, 32>}, {transform_indices = @transform_4, window_bounds = array<i64: 1, 8, 32>}, {transform_indices = @transform_5, window_bounds = array<i64: 1, 8, 4>}]} {
    %c0_i32 = arith.constant 0 : i32
    %0 = arith.cmpi eq, %arg1, %c0_i32 : i32
    %1 = arith.extui %0 : i1 to i32
    %c0_i32_0 = arith.constant 0 : i32
    %2 = arith.cmpi ne, %1, %c0_i32_0 : i32
    scf.if %2 {
      %cst_22 = arith.constant 0.000000e+00 : f32
      %28 = vector.broadcast %cst_22 : f32 to vector<1x8x4xf32>
      %c0_23 = arith.constant 0 : index
      %c0_24 = arith.constant 0 : index
      %c0_25 = arith.constant 0 : index
      %29 = vector.load %arg7[%c0_23, %c0_24, %c0_25] : memref<1x8x4xf32, #tpu.memory_space<vmem>>, vector<1x8x4xf32>
      tpu.vector_store %arg7[%c0_23, %c0_24, %c0_25], %28 {strides = array<i32>} : memref<1x8x4xf32, #tpu.memory_space<vmem>>, vector<1x8x4xf32>,
    } else {
    }
    %c0 = arith.constant 0 : index
    %c0_1 = arith.constant 0 : index
    %c0_2 = arith.constant 0 : index
    %3 = vector.load %arg2[%c0, %c0_1, %c0_2] : memref<1x8x16xf32, #tpu.memory_space<vmem>>, vector<1x8x16xf32>
    %4 = vector.shape_cast %3 : vector<1x8x16xf32> to vector<8x16xf32>
    %c0_3 = arith.constant 0 : index
    %c0_4 = arith.constant 0 : index
    %5 = vector.load %arg3[%c0_3, %c0_4] : memref<16x32xf32, #tpu.memory_space<vmem>>, vector<16x32xf32>
    %cst = arith.constant dense<0.000000e+00> : vector<8x32xf32>
    %6 = tpu.matmul %4, %5, %cst {dimension_numbers = #tpu.dot_dimension_numbers<[1], [0], [0], [1], [0, 0, 1, 1], [], []>} : vector<8x16xf32>, vector<16x32xf32>, vector<8x32xf32> -> vector<8x32xf32>
    %c0_5 = arith.constant 0 : index
    %c0_6 = arith.constant 0 : index
    %7 = vector.load %arg4[%c0_5, %c0_6] : memref<1x32xf32, #tpu.memory_space<vmem>>, vector<1x32xf32>
    %8 = vector.broadcast %7 : vector<1x32xf32> to vector<8x32xf32>
    %9 = arith.addf %6, %8 : vector<8x32xf32>
    %10 = vector.shape_cast %9 : vector<8x32xf32> to vector<1x8x32xf32>
    %c0_7 = arith.constant 0 : index
    %c0_8 = arith.constant 0 : index
    %c0_9 = arith.constant 0 : index
    %11 = vector.load %arg6[%c0_7, %c0_8, %c0_9] : memref<1x8x32xf32, #tpu.memory_space<vmem>>, vector<1x8x32xf32>
    tpu.vector_store %arg6[%c0_7, %c0_8, %c0_9], %10 {strides = array<i32>} : memref<1x8x32xf32, #tpu.memory_space<vmem>>, vector<1x8x32xf32>,
    %12 = arith.mulf %9, %9 : vector<8x32xf32>
    %cst_10 = arith.constant dense<0.000000e+00> : vector<8xf32>
    %13 = vector.multi_reduction <add>, %12, %cst_10 [1] : vector<8x32xf32> to vector<8xf32>
    %14 = vector.shape_cast %13 : vector<8xf32> to vector<8x1xf32>
    %15 = math.sqrt %14 : vector<8x1xf32>
    %cst_11 = arith.constant 9.99999996E-13 : f32
    %16 = vector.broadcast %cst_11 : f32 to vector<8x1xf32>
    %17 = arith.maximumf %15, %16 : vector<8x1xf32>
    %18 = vector.broadcast %17 : vector<8x1xf32> to vector<8x32xf32>
    %19 = arith.divf %9, %18 : vector<8x32xf32>
    %c0_12 = arith.constant 0 : index
    %c0_13 = arith.constant 0 : index
    %20 = vector.load %arg5[%c0_12, %c0_13] : memref<4x32xf32, #tpu.memory_space<vmem>>, vector<4x32xf32>
    %cst_14 = arith.constant dense<0.000000e+00> : vector<8x4xf32>
    %21 = tpu.matmul %19, %20, %cst_14 {dimension_numbers = #tpu.dot_dimension_numbers<[1], [1], [0], [0], [0, 0, 1, 0], [], []>} : vector<8x32xf32>, vector<4x32xf32>, vector<8x4xf32> -> vector<8x4xf32>
    %c0_15 = arith.constant 0 : index
    %c0_16 = arith.constant 0 : index
    %c0_17 = arith.constant 0 : index
    %22 = vector.load %arg7[%c0_15, %c0_16, %c0_17] : memref<1x8x4xf32, #tpu.memory_space<vmem>>, vector<1x8x4xf32>
    %23 = vector.shape_cast %21 : vector<8x4xf32> to vector<1x8x4xf32>
    %cst_18 = arith.constant dense<0.000000e+00> : vector<8x4xf32>
    %24 = vector.multi_reduction <add>, %23, %cst_18 [0] : vector<1x8x4xf32> to vector<8x4xf32>
    %25 = vector.shape_cast %24 : vector<8x4xf32> to vector<1x8x4xf32>
    %26 = arith.addf %22, %25 : vector<1x8x4xf32>
    %c0_19 = arith.constant 0 : index
    %c0_20 = arith.constant 0 : index
    %c0_21 = arith.constant 0 : index
    %27 = vector.load %arg7[%c0_19, %c0_20, %c0_21] : memref<1x8x4xf32, #tpu.memory_space<vmem>>, vector<1x8x4xf32>
    tpu.vector_store %arg7[%c0_19, %c0_20, %c0_21], %26 {strides = array<i32>} : memref<1x8x4xf32, #tpu.memory_space<vmem>>, vector<1x8x4xf32>,
    return
  }
  func.func @transform_0(%arg0: i32, %arg1: i32) -> (i32, i32, i32) {
    %c1_i32 = arith.constant 1 : i32
    %0 = arith.muli %arg0, %c1_i32 : i32
    %1 = arith.addi %0, %arg1 : i32
    %c0_i32 = arith.constant 0 : i32
    %c0_i32_0 = arith.constant 0 : i32
    %c0_i32_1 = arith.constant 0 : i32
    return %1, %c0_i32, %c0_i32_0 : i32, i32, i32
  }
  func.func @transform_1(%arg0: i32, %arg1: i32) -> (i32, i32) {
    %c0_i32 = arith.constant 0 : i32
    %c0_i32_0 = arith.constant 0 : i32
    %c0_i32_1 = arith.constant 0 : i32
    return %c0_i32, %c0_i32_0 : i32, i32
  }
  func.func @transform_2(%arg0: i32, %arg1: i32) -> (i32, i32) {
    %c0_i32 = arith.constant 0 : i32
    %c0_i32_0 = arith.constant 0 : i32
    %c0_i32_1 = arith.constant 0 : i32
    return %c0_i32, %c0_i32_0 : i32, i32
  }
  func.func @transform_3(%arg0: i32, %arg1: i32) -> (i32, i32) {
    %c0_i32 = arith.constant 0 : i32
    %c0_i32_0 = arith.constant 0 : i32
    %c0_i32_1 = arith.constant 0 : i32
    return %c0_i32, %c0_i32_0 : i32, i32
  }
  func.func @transform_4(%arg0: i32, %arg1: i32) -> (i32, i32, i32) {
    %c1_i32 = arith.constant 1 : i32
    %0 = arith.muli %arg0, %c1_i32 : i32
    %1 = arith.addi %0, %arg1 : i32
    %c0_i32 = arith.constant 0 : i32
    %c0_i32_0 = arith.constant 0 : i32
    %c0_i32_1 = arith.constant 0 : i32
    return %1, %c0_i32, %c0_i32_0 : i32, i32, i32
  }
  func.func @transform_5(%arg0: i32, %arg1: i32) -> (i32, i32, i32) {
    %c0_i32 = arith.constant 0 : i32
    %c0_i32_0 = arith.constant 0 : i32
    %c0_i32_1 = arith.constant 0 : i32
    return %arg0, %c0_i32, %c0_i32_0 : i32, i32, i32
  }
}

</mosaic_0001>

<bundles_post_ra>
// kernel: tpu_custom_call.1
= control target key start
LH: loop header
LB: loop body
LE: loop exit
PB: predicated region body
PF: predicated region fallthrough
CT: control target
= control target key end

     0   :  { %11 = vsyncpa [#allocation3], 0  ;;  %s1148_s0 = inlined_call_operand.hbm [shape: f32[2,8,16], index: 0, kind: input, shape index: {}]   ;;  %s1149_s1 = inlined_call_operand.hbm [shape: f32[16,32], index: 1, kind: input, shape index: {}]   ;;  %s1150_s2 = inlined_call_operand.vmem [shape: f32[1,32], index: 2, kind: input, shape index: {}]   ;;  %s1151_s3 = inlined_call_operand.vmem [shape: f32[4,32], index: 3, kind: input, shape index: {}]   ;;  %s1152_s4 = inlined_call_operand.hbm [shape: f32[2,8,32], index: 4, kind: output, shape index: {0}]   ;;  %s1153_s5 = inlined_call_operand.vmem [shape: f32[2,8,4], index: 5, kind: output, shape index: {1}]  }
   0x1   :  { %13 = vsyncpa [#allocation3 + $0x1], 0 }
   0x2   :  { %14 = vsyncpa [#allocation6], 0 }
   0x3   :  { %15 = vsyncpa [#allocation4], 0 }
   0x4   :  { %17 = vsyncpa [#allocation4 + $0x1], 0  ;;  %s914_s18 = smov 0   ;;  %s916_s19 = smov 0  }
   0x5   :  { %s918_s20 = smov 0   ;;  %s920_s21 = smov 0  }
   0x6   :  { %s922_s22 = smov 0   ;;  %s924_s23 = smov 0  }
   0x7 LB: > { %s608_s24 = sadd.s32 4294967295, %s874_s23   ;;  %s609_s25 = sadd.s32 4294967294, %s874_s23   ;;  %s874_s23 = sphi %s924_s23, %s23_s23   ;;  %s870_s22 = sphi %s922_s22, %s1177_s22   ;;  %s866_s21 = sphi %s920_s21, %s1176_s21   ;;  %s862_s20 = sphi %s918_s20, %s1175_s20   ;;  %s858_s19 = sphi %s916_s19, %s1174_s19   ;;  %s854_s18 = sphi %s914_s18, %s1173_s18  }
   0x8   : > { %p57_p0 = scmp.ne.s32.totalorder %s858_s19, %s854_s18  ;;  %p948_p1 = scmp.eq.s32.totalorder %s608_s24, 0 }
   0x9   : > { %p952_p2 = scmp.eq.s32.totalorder %s608_s24, 1  ;;  %p152_p3 = scmp.eq.s32.totalorder %s609_s25, 1 }
   0xa   : > { %s1158_s26 = scalar_select %p948_p1, 1, 0 }
   0xb   : > { %s1159_s27 = scalar_select %p952_p2, 1, 0 }
   0xc   : > { %p958_p4 = por %p948_p1, %p57_p0  ;;  %p610_p5 = scmp.ge.s32.totalorder %s874_s23, 1 }
   0xd   : > { %p963_p6 = por %p152_p3, %p57_p0  ;;  %p185_p7 = scmp.lt.s32.totalorder %s874_s23, 3 }
   0xe   : > { %s1160_s28 = scalar_select %p958_p4, 1, 0 }
   0xf   : > { %s1161_s29 = scalar_select %p963_p6, 1, 0 }
  0x10   : > { %p968_p8 = pnand %p610_p5, %p185_p7  ;;  %s876_s6 = smov [#allocation5]  }
  0x11   : > { %s197_s7 = sshll.u32 %s876_s6, 4  ;;  %s35_s9 = sadd.s32 1, %s870_s22  ;;  %s198_s7 = int_to_ptr.vmem [resolvable:$true] %s197_s7 }
  0x12   : > { %s1162_s30 = scalar_select %p968_p8, 1, 0 }
  0x13   : > { %p656_p9 = pneg %p968_p8  ;;  %s730_s12 = scalar_lea.hbm %s1149_s1, 256 }
  0x14   : > { %p731_p12 = scmp.ne.s32.totalorder %s1149_s1, %s730_s12  ;;  %p737_p5 = scmp.lt.u32.totalorder %s730_s12, %s1149_s1 }
  0x15   : > { %p977_p11 = pnand %p656_p9, %p948_p1 }
  0x17   : > { %p732_p13 = pneg %p977_p11 }
  0x19   : > { %p733_p0 = pnand %p732_p13, %p731_p12 }
  0x1b   : > { %p734_p3 = pneg %p733_p0 }
  0x1d   : > { %p739_p7 = pnand %p737_p5, %p734_p3 }
  0x1f   : > { %742 = shalt.err (!%p739_p7)
}
  0x20   : > { %s743_s17 = scalar_lea.vmem %s198_s7, 256  ;;  %p751_p1 = scmp.lt.s32.totalorder %s198_s7, %s198_s7 }
  0x21   : > { %p744_p9 = scmp.ne.s32.totalorder %s198_s7, %s743_s17  ;;  %p752_p4 = scmp.lt.s32.totalorder %s743_s17, %s743_s17 }
  0x23   : > { %p746_p10 = pnand %p744_p9, %p732_p13  ;;  %p753_p8 = por %p752_p4, %p751_p1 }
  0x25   : > { %p747_p6 = pneg %p746_p10 }
  0x27   : > { %p754_p2 = pnand %p753_p8, %p747_p6 }
  0x29   : > { %757 = shalt.err (!%p754_p2)
}
  0x2a   : > { %s877_s24 = smov 128   ;;  %s878_s25 = smov 8  }
  0x2b   : > { %659 = dma.hbm_to_vmem [thread:$0]  (!%p977_p11), %s1149_s1, 256, %s198_s7, [#allocation6], %s877_s24, %s877_s24, %s878_s25  }
  0x2c   : > { %p37_p1 = scmp.ge.s32.totalorder %s35_s9, 2  ;;  %s44_s11 = sadd.s32 1, %s862_s20 }
  0x2d   : > { %p51_p2 = scmp.ne.s32.totalorder %s862_s20, %s858_s19  ;;  %p52_p4 = scmp.eq.s32.totalorder %s874_s23, 0 }
  0x2e   : > { %s1179_s9 = smov (%p37_p1, %s35_s9), 0  ;;  %p1165_p8 = scmp.ne.s32.totalorder %s1159_s27, 0 }
  0x2f   : > { %p1004_p6 = por %p52_p4, %p51_p2  ;;  %s41_s8 = ssub.s32 %s870_s22, %s1179_s9 }
  0x30   : > { %p1010_p10 = por %p1165_p8, %p51_p2  ;;  %p669_p12 = scmp.lt.s32.totalorder %s874_s23, 2 }
  0x31   : > { %p42_p11 = scmp.eq.s32.totalorder %s41_s8, 0  ;;  %s217_s7 = sand.u32 1, %s862_s20  }
  0x32   : > { %s613_s14 = sshll.u32 %s217_s7, 3  ;;  %s614_s16 = sshll.u32 %s870_s22, 7 }
  0x33   : > { %s1019_s15 = scalar_select %p42_p11, %s862_s20, %s44_s11  }
  0x34   : > { %s1025_s25 = scalar_lea.hbm %s1148_s0, %s614_s16  ;;  %s221_s27 = scalar_lea.vmem [#allocation2], %s613_s14 }
  0x35   : > { %s229_s6 = sshll.u32 %s221_s27, 4  ;;  %p1031_p13 = pnand %p669_p12, %p1004_p6  ;;  %s1027_s6 = int_to_ptr.vmem [resolvable:$true] %s229_s6 }
  0x36   : > { %s218_s11 = scalar_lea.sflag [#allocation3], %s217_s7  ;;  %s758_s8 = scalar_lea.hbm %s1025_s25, 128 }
  0x37   : > { %p759_p0 = scmp.ne.s32.totalorder %s1025_s25, %s758_s8  ;;  %p760_p3 = pneg %p1031_p13 }
  0x38   : > { %s763_s17 = scalar_lea.hbm %s1148_s0, 256  ;;  %p764_p9 = scmp.lt.u32.totalorder %s1025_s25, %s1148_s0 }
  0x39   : > { %p761_p5 = pnand %p760_p3, %p759_p0  ;;  %p765_p1 = scmp.lt.u32.totalorder %s763_s17, %s758_s8 }
  0x3a   : > { %p767_p4 = scmp.lt.u32.totalorder %s758_s8, %s1025_s25 }
  0x3b   : > { %p762_p7 = pneg %p761_p5  ;;  %p766_p2 = por %p765_p1, %p764_p9 }
  0x3d   : > { %p768_p6 = por %p767_p4, %p766_p2 }
  0x3f   : > { %p769_p8 = pnand %p768_p6, %p762_p7 }
  0x41   : > { %772 = shalt.err (!%p769_p8)
}
  0x42   : > { %s773_s7 = scalar_lea.vmem %s1027_s6, 128  ;;  %s879_s27 = smov [#allocation2]  }
  0x43   : > { %p774_p12 = scmp.ne.s32.totalorder %s1027_s6, %s773_s7  ;;  %s778_s14 = sshll.u32 %s879_s27, 4  ;;  %s779_s14 = int_to_ptr.vmem [resolvable:$false] %s778_s14 }
  0x44   : > { %s780_s16 = scalar_lea.vmem %s779_s14, 256  ;;  %p781_p5 = scmp.lt.s32.totalorder %s1027_s6, %s779_s14 }
  0x45   : > { %p776_p11 = pnand %p774_p12, %p760_p3  ;;  %p782_p9 = scmp.lt.s32.totalorder %s780_s16, %s773_s7 }
  0x47   : > { %p777_p0 = pneg %p776_p11  ;;  %p783_p1 = por %p782_p9, %p781_p5 }
  0x49   : > { %p784_p2 = pnand %p783_p1, %p777_p0 }
  0x4b   : > { %787 = shalt.err (!%p784_p2)
}
  0x4c   : > { %663 = dma.hbm_to_vmem [thread:$0]  (!%p1031_p13), %s1025_s25, 128, %s1027_s6, %s218_s11  }
  0x4d   : > { %p1168_p7 = scmp.ne.s32.totalorder %s1162_s30, 0 }
  0x4e   : > { %s1063_s8 = sand.u32 (!%p1168_p7), 1, %s858_s19   ;;  %p1169_p3 = scmp.ne.s32.totalorder (!%p1168_p7), %s1160_s28, 0 }
  0x4f   : > { %238 = sbr.rel (%p1168_p7) target bundleno = 701 (0x2bd), region = 36  ;;  %s616_s17 = sshll.u32 (!%p1168_p7), %s1063_s8, 3 }
  0x50   : > { %s241_s12 = scalar_lea.sflag (!%p1168_p7), [#allocation3], %s1063_s8  ;;  %s244_s24 = scalar_lea.vmem (!%p1168_p7), [#allocation2], %s616_s17 }
  0x56   : > { %841 = dma.done.wait (%p1169_p3), %s241_s12, 128  }
  0x57   : > { %843 = vsyncadd (%p1169_p3), %s241_s12, 4294967168  ;;  %p1170_p4 = scmp.ne.s32.totalorder %s1158_s26, 0 }
  0x59   : > { %845 = dma.done.wait (%p1170_p4), [#allocation6], 256  }
  0x5a   : > { %847 = vsyncadd (%p1170_p4), [#allocation6], 4294967040  ;;  %v880_v0 = vmov 0.0|0.0   ;;  %vm881_vm0 = vmmov 0   ;;  %v882_v1 = vmov 0.0   ;;  %v292_v2 = vld [vmem:[#allocation5] sm:$0xff] }
  0x5b   : > { %645 = vmatprep.subr.bf16.mxu0 %v880_v0  ;;  %637 = vmatprep.mubr.msk.f32.mxu0 %vm881_vm0, %v882_v1  ;;  %v293_v3 = vld [vmem:[#allocation5 + $0x8] sm:$0xff]  ;;  %v291_v5 = vld [vmem:[%s244_s24] sm:$0xff]  ;;  %vm301_vm1 = vcmask 130048   ;;  %vm375_vm2 = vcmask 261120   ;;  %s1078_s26 = scalar_lea.vmem [#allocation7], %s616_s17  ;;  %p281_p13 = scmp.lt.s32.totalorder %s866_s21, 1 }
  0x5c   : > { %640 = vmatprep.subr.mxu1 %v882_v1  ;;  %642 = vmatprep.mubr.msk.f32.mxu1 %vm881_vm0, %v882_v1  ;;  %v646_v4 = vpack.c.bf16 %v293_v3, %v292_v2  ;;  %v620_v6 = vld [vmem:[%s1150_s2] ss:$0 sm:$0xff]  ;;  %vm289_vm3 = vcmask 31744   ;;  %s625_s16 = sshll.u32 %s866_s21, 7  ;;  %s491_s17 = sshll.u32 %s1078_s26, 4  ;;  %s492_s17 = int_to_ptr.vmem [resolvable:$true] %s491_s17 }
  0x5d   : > { %v391_v12 = vld [vmem:[%s1151_s3] sm:$0xf]  ;;  %s282_s10 = scalar_select %p281_p13, %s866_s21, 1 }
  0x5e   : > { %647 = vmatpush3.bf16.msra.mxu0 %v646_v4  ;;  %641 = vmatpush3.xpose.msk.msra.mxu1 %vm375_vm2, %v391_v12  ;;  %s1102_s28 = scalar_lea.hbm %s1152_s4, %s625_s16  ;;  %s473_s30 = scalar_lea.sflag [#allocation4], %s1063_s8 }
  0x5f   : > { %s619_s11 = sshll.u32 %s282_s10, 3  ;;  %s788_s25 = scalar_lea.vmem %s492_s17, 128 }
  0x60   : > { %s1092_s14 = scalar_lea.vmem %s1153_s5, %s619_s11  ;;  %p789_p6 = scmp.ne.s32.totalorder %s492_s17, %s788_s25 }
  0x61   : > { %638 = vmatmul.mubr.msk.f32.vlgmr.msra.gmra.mrb[0].mxu0 %vm301_vm1, %v291_v5  ;;  %290 = vst.msk [vmem:[%s1092_s14] sm:$0xff] %vm289_vm3, %v882_v1  ;;  %s883_s6 = smov [#allocation7]  }
  0x62   : > { %p790_p8 = pnand %p789_p6, %p1010_p10  ;;  %s792_s10 = sshll.u32 %s883_s6, 4  ;;  %s793_s10 = int_to_ptr.vmem [resolvable:$false] %s792_s10 }
  0x63   : > { %s794_s11 = scalar_lea.vmem %s793_s10, 256  ;;  %p795_p11 = scmp.lt.s32.totalorder %s492_s17, %s793_s10 }
  0x64   : > { %p791_p12 = pneg %p790_p8  ;;  %p796_p0 = scmp.lt.s32.totalorder %s794_s11, %s788_s25 }
  0x66   : > { %p797_p5 = por %p796_p0, %p795_p11 }
  0x68   : > { %p798_p9 = pnand %p797_p5, %p791_p12 }
 0x134   : > { %v371_v7 = vpop.f32.mrb[0].mxu0 }
 0x135   : > { %v372_v8 = vadd.f32 %v620_v6, %v371_v7  ;;  %v639_v9 = vpop.f32.mrb[1].mxu0 }
 0x137   : > { %v377_v10 = vmul.f32 %v372_v8, %v372_v8  ;;  %376 = vst.msk [vmem:[%s1078_s26] sm:$0xff] %vm375_vm2, %v372_v8 }
 0x139   : > { %v378_v11 = vsel %vm375_vm2, %v377_v10, 0.0 }
 0x13a   : > { %379 = vadd.xlane.f32.xlu0 %v378_v11 }
 0x1c7   : > { %v380_v13 = vpop.xlane.xlu0 %379 }
 0x1c8   : > { %726 = vrsqrt.f32 %v380_v13  ;;  %vm383_vm4 = vcmp.eq.f32.partialorder %v380_v13, inf  ;;  %v386_v16 = vand.u32 2147483648, %v380_v13  ;;  %vm385_vm5 = vcmp.eq.f32.partialorder %v380_v13, 0.0 }
 0x1d2   : > { %v727_v14 = vpop.eup %726 }
 0x1d3   : > { %v382_v15 = vmul.f32 %v727_v14, %v380_v13 }
 0x1d5   : > { %v384_v17 = vsel %vm383_vm4, %v380_v13, %v382_v15 }
 0x1d6   : > { %v387_v18 = vsel %vm385_vm5, %v386_v16, %v384_v17 }
 0x1d7   : > { %v388_v19 = vmax.f32 %v387_v18, 1e-12 }
 0x1d9   : > { %728 = vrcp.f32 %v388_v19 }
 0x1e3   : > { %v729_v20 = vpop.eup %728 }
 0x1e4   : > { %v390_v21 = vmul.f32 %v729_v20, %v372_v8 }
 0x1e6   : > { %643 = vmatmul.mubr.msk.f32.vlgmr.msra.gmra.mrb[0].mxu1 %vm375_vm2, %v390_v21 }
 0x1e7   : > { %801 = shalt.err (!%p798_p9)
}
 0x1e8   : > { %s802_s21 = scalar_lea.hbm %s1102_s28, 128  ;;  %s806_s7 = scalar_lea.hbm %s1152_s4, 256 }
 0x1e9   : > { %p803_p1 = scmp.ne.s32.totalorder %s1102_s28, %s802_s21  ;;  %p807_p3 = scmp.lt.u32.totalorder %s1102_s28, %s1152_s4 }
 0x1ea   : > { %p808_p4 = scmp.lt.u32.totalorder %s806_s7, %s802_s21  ;;  %p810_p6 = scmp.lt.u32.totalorder %s802_s21, %s1102_s28 }
 0x1eb   : > { %p804_p2 = pnand %p803_p1, %p1010_p10 }
 0x1ec   : > { %p809_p13 = por %p808_p4, %p807_p3 }
 0x1ed   : > { %p805_p7 = pneg %p804_p2 }
 0x1ee   : > { %p811_p8 = por %p810_p6, %p809_p13 }
 0x1f0   : > { %p812_p12 = pnand %p811_p8, %p805_p7 }
 0x1f2   : > { %815 = shalt.err (!%p812_p12)
}
 0x1f3   : > { %654 = dma.vmem_to_hbm [thread:$0]  (%p1010_p10), %s492_s17, 128, %s1102_s28, %s473_s30   ;;  %v392_v22 = vld [vmem:[%s1092_s14] sm:$0xff] }
 0x2b9   : > { %v465_v23 = vpop.f32.mrb[0].mxu1 }
 0x2ba   : > { %v469_v24 = vadd.f32 %v465_v23, %v392_v22  ;;  %v644_v25 = vpop.f32.mrb[1].mxu1 }
 0x2bc   : > { %471 = vst.msk [vmem:[%s1092_s14] sm:$0xff] %vm289_vm3, %v469_v24 }
 0x2bd PF: > { %s506_s12 = sand.u32 1, %s854_s18   ;;  %p1171_p11 = scmp.ne.s32.totalorder %s1161_s29, 0 }
 0x2be   : > { %p1172_p0 = scmp.ge.s32.totalorder %s874_s23, 2  ;;  %s507_s24 = scalar_lea.sflag [#allocation4], %s506_s12 }
 0x2c0   : > { %p665_p5 = pnand %p1172_p0, %p1171_p11 }
 0x2c2   : > { %849 = dma.done.wait (!%p665_p5), %s507_s24, 128  }
 0x2c3   : > { %851 = vsyncadd (!%p665_p5), %s507_s24, 4294967168  ;;  %s23_s23 = sadd.s32 1, %s874_s23   ;;  %s1173_s18 = smov %s858_s19 }
 0x2c4   : > { %p20_p10 = scmp.ge.s32.totalorder %s23_s23, 4   ;;  %s1174_s19 = smov %s862_s20 }
 0x2c5   : > { %s1175_s20 = smov %s1019_s15  ;;  %s1176_s21 = smov %s870_s22 }
 0x2c6   : > { %s1177_s22 = smov %s1179_s9  ;;  %22 = sbr.rel (!%p20_p10) target bundleno = 7 (0x7), region = 101 }
 0x2cd   :  { %519 = vsyncpa [#allocation3], 1 }
 0x2ce   :  { %521 = vsyncpa [#allocation3 + $0x1], 1 }
 0x2cf   :  { %522 = vsyncpa [#allocation6], 1 }
 0x2d0   :  { %523 = vsyncpa [#allocation4], 1 }
 0x2d1   :  { %525 = vsyncpa [#allocation4 + $0x1], 1 }

</bundles_post_ra>
